<compile_context>
chip_gen: v5e
topology: v5e:2x2
jax: 0.10.0
libtpu: 0.0.40
codegen_flags: <defaults>
</compile_context>

<pallas_src>
import math

import jax
import jax.numpy as jnp
from jax.experimental import pallas as pl
from jax.experimental.pallas import tpu as pltpu

SELU_ALPHA = 1.6732632423543772
SELU_SCALE = 1.0507009873554805
BN_EPS = 1e-5
LANE = 128


def _round_up(x, m):
    return (x + m - 1) // m * m


def _pad_last(x, target):
    pad = target - x.shape[-1]
    if pad == 0:
        return x
    cfg = [(0, 0)] * (x.ndim - 1) + [(0, pad)]
    return jnp.pad(x, cfg)


def _pad_2d(x, rows, cols):
    pr, pc = rows - x.shape[0], cols - x.shape[1]
    if pr == 0 and pc == 0:
        return x
    return jnp.pad(x, ((0, pr), (0, pc)))


# --------------------------------------------------------------------------
# Stage 1: per batch element  z1 = SELU(adj @ (seq @ W1 + b1))
#          plus per-node partial sums for BN1 (sum, sum of squares over feat).
# --------------------------------------------------------------------------
def _stage1_kernel(seq_ref, adj_ref, w1_ref, b1_ref, z1_ref, s_ref, ss_ref):
    # seq_ref: (N, Ip) bf16, adj_ref: (N, N) bf16, w1_ref: (Ip, Hp) bf16,
    # b1_ref: (1, Hp) f32
    h = jnp.dot(seq_ref[...], w1_ref[...],
                preferred_element_type=jnp.float32) + b1_ref[...]
    z = jnp.dot(adj_ref[...], h.astype(jnp.bfloat16),
                preferred_element_type=jnp.float32)
    # SELU (keep the select form: exp(z) for z>0 is discarded, never blended)
    z = SELU_SCALE * jnp.where(z > 0, z, SELU_ALPHA * (jnp.exp(z) - 1.0))
    z1_ref[...] = z
    s_ref[...] = jnp.sum(z, axis=-1, keepdims=True)          # (N, 1)
    ss_ref[...] = jnp.sum(z * z, axis=-1, keepdims=True)     # (N, 1)


# --------------------------------------------------------------------------
# Stage 2: per batch element  z2 = adj @ ((BN1(z1)) @ W2)
#          plus per-node partial sums for BN2.
# BN1 is applied as z1 * scale1 + shift1 with scale1/shift1 precomputed from
# the stage-1 statistics (tiny XLA glue between the two pallas_calls).
# --------------------------------------------------------------------------
def _stage2_kernel(z1_ref, adj_ref, w2_ref, sc1_ref, sh1_ref,
                   z2_ref, s_ref, ss_ref):
    hn = z1_ref[...] * sc1_ref[...] + sh1_ref[...]            # (N, Hp) f32
    h2 = jnp.dot(hn.astype(jnp.bfloat16), w2_ref[...],
                 preferred_element_type=jnp.float32)          # (N, Op)
    z = jnp.dot(adj_ref[...], h2.astype(jnp.bfloat16),
                preferred_element_type=jnp.float32)           # (N, Op)
    z2_ref[...] = z
    s_ref[...] = jnp.sum(z, axis=-1, keepdims=True)
    ss_ref[...] = jnp.sum(z * z, axis=-1, keepdims=True)


# --------------------------------------------------------------------------
# Stage 3: per batch element  out = ReLU(z2 * scale2 + shift2)   (lane-dense)
# --------------------------------------------------------------------------
def _stage3_kernel(z2_ref, sc2_ref, sh2_ref, out_ref):
    out_ref[...] = jnp.maximum(z2_ref[...] * sc2_ref[...] + sh2_ref[...], 0.0)


def gcn_forward(seq, adj, params):
    B, N, in_ft = seq.shape
    hidden = params['w1'].shape[1]
    out_ft = params['w2'].shape[1]
    Ip = _round_up(in_ft, LANE)
    Hp = _round_up(hidden, LANE)
    Op = _round_up(out_ft, LANE)

    # ---- wrapper-side padding / dtype prep (layout plumbing, not compute) ----
    seq_p = _pad_last(seq, Ip).astype(jnp.bfloat16)               # (B, N, Ip)
    adj_b = adj.astype(jnp.bfloat16)                              # (B, N, N)
    w1_p = _pad_2d(params['w1'], Ip, Hp).astype(jnp.bfloat16)     # (Ip, Hp)
    b1_p = _pad_last(params['b1'], Hp).astype(jnp.float32)        # (1, Hp)
    w2_p = _pad_2d(params['w2'], Hp, Op).astype(jnp.bfloat16)     # (Hp, Op)

    cparams = pltpu.CompilerParams(
        dimension_semantics=("parallel",),
        vmem_limit_bytes=32 * 1024 * 1024)

    def batch_spec(last_dim):
        # one batch element per grid step, squeezed -> 2-D (N, last_dim) ref
        return pl.BlockSpec((None, N, last_dim), lambda b: (b, 0, 0))

    def const_spec(shape):
        # grid-invariant block (weights / BN affine): stays VMEM resident
        return pl.BlockSpec(shape, lambda b: (0,) * len(shape))

    # ---------------- stage 1 -------------------------------------------------
    flops1 = 2 * B * N * Ip * Hp + 2 * B * N * N * Hp + 6 * B * N * Hp
    bytes1 = (2 * (B * N * Ip + B * N * N + Ip * Hp) + 4 * Hp
              + 4 * (B * N * Hp + 2 * B * N))
    z1, s1, ss1 = pl.pallas_call(
        _stage1_kernel,
        grid=(B,),
        in_specs=[batch_spec(Ip), batch_spec(N),
                  const_spec((Ip, Hp)), const_spec((1, Hp))],
        out_specs=(batch_spec(Hp), batch_spec(1), batch_spec(1)),
        out_shape=(jax.ShapeDtypeStruct((B, N, Hp), jnp.float32),
                   jax.ShapeDtypeStruct((B, N, 1), jnp.float32),
                   jax.ShapeDtypeStruct((B, N, 1), jnp.float32)),
        compiler_params=cparams,
        cost_estimate=pl.CostEstimate(flops=flops1,
                                      transcendentals=B * N * Hp,
                                      bytes_accessed=bytes1),
    )(seq_p, adj_b, w1_p, b1_p)

    # BN1 statistics (exact, per node over (batch, true hidden features));
    # padded feature columns are identically zero so they contribute nothing.
    cnt1 = float(B * hidden)
    mean1 = jnp.sum(s1, axis=0) / cnt1                           # (N, 1)
    var1 = jnp.maximum(jnp.sum(ss1, axis=0) / cnt1 - mean1 * mean1, 0.0)
    scale1 = params['g1'] * jax.lax.rsqrt(var1 + BN_EPS)          # (N, 1)
    shift1 = params['be1'] - mean1 * scale1                       # (N, 1)

    # ---------------- stage 2 -------------------------------------------------
    flops2 = 2 * B * N * Hp * Op + 2 * B * N * N * Op + 6 * B * N * Hp
    bytes2 = (4 * B * N * Hp + 2 * (B * N * N + Hp * Op) + 8 * N
              + 4 * (B * N * Op + 2 * B * N))
    z2, s2, ss2 = pl.pallas_call(
        _stage2_kernel,
        grid=(B,),
        in_specs=[batch_spec(Hp), batch_spec(N),
                  const_spec((Hp, Op)), const_spec((N, 1)), const_spec((N, 1))],
        out_specs=(batch_spec(Op), batch_spec(1), batch_spec(1)),
        out_shape=(jax.ShapeDtypeStruct((B, N, Op), jnp.float32),
                   jax.ShapeDtypeStruct((B, N, 1), jnp.float32),
                   jax.ShapeDtypeStruct((B, N, 1), jnp.float32)),
        compiler_params=cparams,
        cost_estimate=pl.CostEstimate(flops=flops2,
                                      transcendentals=0,
                                      bytes_accessed=bytes2),
    )(z1, adj_b, w2_p, scale1, shift1)

    # BN2 statistics (padded output columns are zero -> sums are exact).
    cnt2 = float(B * out_ft)
    mean2 = jnp.sum(s2, axis=0) / cnt2
    var2 = jnp.maximum(jnp.sum(ss2, axis=0) / cnt2 - mean2 * mean2, 0.0)
    scale2 = params['g2'] * jax.lax.rsqrt(var2 + BN_EPS)
    shift2 = params['be2'] - mean2 * scale2

    # ---------------- stage 3: BN2 apply + ReLU (lane-dense output) -----------
    out_p = pl.pallas_call(
        _stage3_kernel,
        grid=(B,),
        in_specs=[batch_spec(Op), const_spec((N, 1)), const_spec((N, 1))],
        out_specs=batch_spec(Op),
        out_shape=jax.ShapeDtypeStruct((B, N, Op), jnp.float32),
        compiler_params=cparams,
        cost_estimate=pl.CostEstimate(flops=3 * B * N * Op,
                                      transcendentals=0,
                                      bytes_accessed=8 * B * N * Op),
    )(z2, scale2, shift2)

    return out_p[:, :, :out_ft]


def gcn_reference(seq, adj, params):
    """Pure-JAX f32 reference of the PyTorch forward (training-mode BN)."""
    h = jnp.einsum('bni,ih->bnh', seq, params['w1']) + params['b1'][None]
    h = jnp.einsum('bnm,bmh->bnh', adj, h)
    h = SELU_SCALE * jnp.where(h > 0, h, SELU_ALPHA * (jnp.exp(h) - 1.0))

    def bn(x, g, be):
        m = jnp.mean(x, axis=(0, 2), keepdims=True)
        v = jnp.mean((x - m) ** 2, axis=(0, 2), keepdims=True)
        return (x - m) * jax.lax.rsqrt(v + BN_EPS) * g[None] + be[None]

    h = bn(h, params['g1'], params['be1'])
    h = jnp.einsum('bnh,ho->bno', h, params['w2'])
    h = jnp.einsum('bnm,bmo->bno', adj, h)
    h = bn(h, params['g2'], params['be2'])
    return jnp.maximum(h, 0.0)


def init_params(key, in_ft, hidden, out_ft, nb_nodes):
    """Matches the module: xavier_uniform(gain=2.0) for Linear weights,
    zero Linear biases, BatchNorm affine = (1, 0)."""
    k1, k2 = jax.random.split(key)

    def xavier(k, fan_in, fan_out):
        bound = 2.0 * math.sqrt(6.0 / (fan_in + fan_out))
        # stored as (in, out) so the kernel does x @ W directly
        return jax.random.uniform(k, (fan_in, fan_out), jnp.float32,
                                  minval=-bound, maxval=bound)

    return {
        'w1': xavier(k1, in_ft, hidden),
        'b1': jnp.zeros((1, hidden), jnp.float32),
        'w2': xavier(k2, hidden, out_ft),
        'g1': jnp.ones((nb_nodes, 1), jnp.float32),
        'be1': jnp.zeros((nb_nodes, 1), jnp.float32),
        'g2': jnp.ones((nb_nodes, 1), jnp.float32),
        'be2': jnp.zeros((nb_nodes, 1), jnp.float32),
    }


if __name__ == "__main__":
    B, N, IN_FT, HIDDEN, OUT_FT = 2, 8, 16, 32, 16

    key = jax.random.PRNGKey(0)
    k_seq, k_adj, k_par = jax.random.split(key, 3)

    seq = jax.random.normal(k_seq, (B, N, IN_FT), jnp.float32)
    # row-normalized adjacency
    a = jax.random.uniform(k_adj, (B, N, N), jnp.float32)
    adj = a / jnp.sum(a, axis=-1, keepdims=True)

    params = init_params(k_par, IN_FT, HIDDEN, OUT_FT, N)

    out = jax.jit(gcn_forward)(seq, adj, params)
    jax.block_until_ready(out)

    assert out.shape == (B, N, OUT_FT) and out.dtype == jnp.float32
    assert bool(jnp.all(jnp.isfinite(out)))

    # Loose tolerance: MXU operands are bf16 (f32 accumulate) by design.
    ref = gcn_reference(seq, adj, params)
    assert bool(jnp.allclose(out, ref, rtol=0.15, atol=0.15))

    print("KERNEL_OK")
</pallas_src>

<mosaic_0001>
module attributes {stable_mosaic.version = 11 : i64} {
  func.func @_stage1_kernel(%arg0: i32, %arg1: memref<1x8x128xbf16, #tpu.memory_space<vmem>>, %arg2: memref<1x8x8xbf16, #tpu.memory_space<vmem>>, %arg3: memref<128x128xbf16, #tpu.memory_space<vmem>>, %arg4: memref<1x128xf32, #tpu.memory_space<vmem>>, %arg5: memref<1x8x128xf32, #tpu.memory_space<vmem>>, %arg6: memref<1x8x1xf32, #tpu.memory_space<vmem>>, %arg7: memref<1x8x1xf32, #tpu.memory_space<vmem>>) attributes {dimension_semantics = [#tpu.dimension_semantics<parallel>], iteration_bounds = array<i64: 2>, scalar_prefetch = 0 : i64, scratch_operands = 0 : i64, tpu.core_type = #tpu.core_type<tc>, window_params = [{transform_indices = @transform_0, window_bounds = array<i64: 1, 8, 128>}, {transform_indices = @transform_1, window_bounds = array<i64: 1, 8, 8>}, {pipeline_mode = #tpu.pipeline_mode<synchronous>, transform_indices = @transform_2, window_bounds = array<i64: 128, 128>}, {pipeline_mode = #tpu.pipeline_mode<synchronous>, transform_indices = @transform_3, window_bounds = array<i64: 1, 128>}, {transform_indices = @transform_4, window_bounds = array<i64: 1, 8, 128>}, {transform_indices = @transform_5, window_bounds = array<i64: 1, 8, 1>}, {transform_indices = @transform_6, window_bounds = array<i64: 1, 8, 1>}]} {
    %c0 = arith.constant 0 : index
    %c0_0 = arith.constant 0 : index
    %c0_1 = arith.constant 0 : index
    %0 = vector.load %arg1[%c0, %c0_0, %c0_1] : memref<1x8x128xbf16, #tpu.memory_space<vmem>>, vector<1x8x128xbf16>
    %1 = vector.shape_cast %0 : vector<1x8x128xbf16> to vector<8x128xbf16>
    %c0_2 = arith.constant 0 : index
    %c0_3 = arith.constant 0 : index
    %2 = vector.load %arg3[%c0_2, %c0_3] : memref<128x128xbf16, #tpu.memory_space<vmem>>, vector<128x128xbf16>
    %cst = arith.constant dense<0.000000e+00> : vector<8x128xf32>
    %3 = tpu.matmul %1, %2, %cst {dimension_numbers = #tpu.dot_dimension_numbers<[1], [0], [0], [1], [0, 0, 1, 1], [], []>} : vector<8x128xbf16>, vector<128x128xbf16>, vector<8x128xf32> -> vector<8x128xf32>
    %c0_4 = arith.constant 0 : index
    %c0_5 = arith.constant 0 : index
    %4 = vector.load %arg4[%c0_4, %c0_5] : memref<1x128xf32, #tpu.memory_space<vmem>>, vector<1x128xf32>
    %5 = vector.broadcast %4 : vector<1x128xf32> to vector<8x128xf32>
    %6 = arith.addf %3, %5 : vector<8x128xf32>
    %c0_6 = arith.constant 0 : index
    %c0_7 = arith.constant 0 : index
    %c0_8 = arith.constant 0 : index
    %7 = vector.load %arg2[%c0_6, %c0_7, %c0_8] : memref<1x8x8xbf16, #tpu.memory_space<vmem>>, vector<1x8x8xbf16>
    %8 = vector.shape_cast %7 : vector<1x8x8xbf16> to vector<8x8xbf16>
    %9 = arith.truncf %6 : vector<8x128xf32> to vector<8x128xbf16>
    %cst_9 = arith.constant dense<0.000000e+00> : vector<8x128xf32>
    %10 = tpu.matmul %8, %9, %cst_9 {dimension_numbers = #tpu.dot_dimension_numbers<[1], [0], [0], [1], [0, 0, 1, 1], [], []>} : vector<8x8xbf16>, vector<8x128xbf16>, vector<8x128xf32> -> vector<8x128xf32>
    %cst_10 = arith.constant 0.000000e+00 : f32
    %11 = vector.broadcast %cst_10 : f32 to vector<8x128xf32>
    %12 = arith.cmpf ogt, %10, %11 : vector<8x128xf32>
    %13 = math.exp %10 : vector<8x128xf32>
    %cst_11 = arith.constant 1.000000e+00 : f32
    %14 = vector.broadcast %cst_11 : f32 to vector<8x128xf32>
    %15 = arith.subf %13, %14 : vector<8x128xf32>
    %cst_12 = arith.constant 1.67326319 : f32
    %16 = vector.broadcast %cst_12 : f32 to vector<8x128xf32>
    %17 = arith.mulf %16, %15 : vector<8x128xf32>
    %18 = arith.select %12, %10, %17 : vector<8x128xi1>, vector<8x128xf32>
    %cst_13 = arith.constant 1.05070102 : f32
    %19 = vector.broadcast %cst_13 : f32 to vector<8x128xf32>
    %20 = arith.mulf %19, %18 : vector<8x128xf32>
    %c0_14 = arith.constant 0 : index
    %c0_15 = arith.constant 0 : index
    %c0_16 = arith.constant 0 : index
    %21 = vector.load %arg5[%c0_14, %c0_15, %c0_16] : memref<1x8x128xf32, #tpu.memory_space<vmem>>, vector<1x8x128xf32>
    %22 = vector.shape_cast %21 : vector<1x8x128xf32> to vector<8x128xf32>
    %23 = vector.shape_cast %20 : vector<8x128xf32> to vector<1x8x128xf32>
    tpu.vector_store %arg5[%c0_14, %c0_15, %c0_16], %23 {strides = array<i32>} : memref<1x8x128xf32, #tpu.memory_space<vmem>>, vector<1x8x128xf32>,
    %cst_17 = arith.constant dense<0.000000e+00> : vector<8xf32>
    %24 = vector.multi_reduction <add>, %20, %cst_17 [1] : vector<8x128xf32> to vector<8xf32>
    %25 = vector.shape_cast %24 : vector<8xf32> to vector<8x1xf32>
    %c0_18 = arith.constant 0 : index
    %c0_19 = arith.constant 0 : index
    %c0_20 = arith.constant 0 : index
    %26 = vector.load %arg6[%c0_18, %c0_19, %c0_20] : memref<1x8x1xf32, #tpu.memory_space<vmem>>, vector<1x8x1xf32>
    %27 = vector.shape_cast %26 : vector<1x8x1xf32> to vector<8x1xf32>
    %28 = vector.shape_cast %25 : vector<8x1xf32> to vector<1x8x1xf32>
    tpu.vector_store %arg6[%c0_18, %c0_19, %c0_20], %28 {strides = array<i32>} : memref<1x8x1xf32, #tpu.memory_space<vmem>>, vector<1x8x1xf32>,
    %29 = arith.mulf %20, %20 : vector<8x128xf32>
    %cst_21 = arith.constant dense<0.000000e+00> : vector<8xf32>
    %30 = vector.multi_reduction <add>, %29, %cst_21 [1] : vector<8x128xf32> to vector<8xf32>
    %31 = vector.shape_cast %30 : vector<8xf32> to vector<8x1xf32>
    %c0_22 = arith.constant 0 : index
    %c0_23 = arith.constant 0 : index
    %c0_24 = arith.constant 0 : index
    %32 = vector.load %arg7[%c0_22, %c0_23, %c0_24] : memref<1x8x1xf32, #tpu.memory_space<vmem>>, vector<1x8x1xf32>
    %33 = vector.shape_cast %32 : vector<1x8x1xf32> to vector<8x1xf32>
    %34 = vector.shape_cast %31 : vector<8x1xf32> to vector<1x8x1xf32>
    tpu.vector_store %arg7[%c0_22, %c0_23, %c0_24], %34 {strides = array<i32>} : memref<1x8x1xf32, #tpu.memory_space<vmem>>, vector<1x8x1xf32>,
    return
  }
  func.func @transform_0(%arg0: i32) -> (i32, i32, i32) {
    %c0_i32 = arith.constant 0 : i32
    %c0_i32_0 = arith.constant 0 : i32
    %c0_i32_1 = arith.constant 0 : i32
    return %arg0, %c0_i32, %c0_i32_0 : i32, i32, i32
  }
  func.func @transform_1(%arg0: i32) -> (i32, i32, i32) {
    %c0_i32 = arith.constant 0 : i32
    %c0_i32_0 = arith.constant 0 : i32
    %c0_i32_1 = arith.constant 0 : i32
    return %arg0, %c0_i32, %c0_i32_0 : i32, i32, i32
  }
  func.func @transform_2(%arg0: i32) -> (i32, i32) {
    %c0_i32 = arith.constant 0 : i32
    %c0_i32_0 = arith.constant 0 : i32
    %c0_i32_1 = arith.constant 0 : i32
    return %c0_i32, %c0_i32_0 : i32, i32
  }
  func.func @transform_3(%arg0: i32) -> (i32, i32) {
    %c0_i32 = arith.constant 0 : i32
    %c0_i32_0 = arith.constant 0 : i32
    %c0_i32_1 = arith.constant 0 : i32
    return %c0_i32, %c0_i32_0 : i32, i32
  }
  func.func @transform_4(%arg0: i32) -> (i32, i32, i32) {
    %c0_i32 = arith.constant 0 : i32
    %c0_i32_0 = arith.constant 0 : i32
    %c0_i32_1 = arith.constant 0 : i32
    return %arg0, %c0_i32, %c0_i32_0 : i32, i32, i32
  }
  func.func @transform_5(%arg0: i32) -> (i32, i32, i32) {
    %c0_i32 = arith.constant 0 : i32
    %c0_i32_0 = arith.constant 0 : i32
    %c0_i32_1 = arith.constant 0 : i32
    return %arg0, %c0_i32, %c0_i32_0 : i32, i32, i32
  }
  func.func @transform_6(%arg0: i32) -> (i32, i32, i32) {
    %c0_i32 = arith.constant 0 : i32
    %c0_i32_0 = arith.constant 0 : i32
    %c0_i32_1 = arith.constant 0 : i32
    return %arg0, %c0_i32, %c0_i32_0 : i32, i32, i32
  }
}

module attributes {stable_mosaic.version = 11 : i64} {
  func.func @_stage2_kernel(%arg0: i32, %arg1: memref<1x8x128xf32, #tpu.memory_space<vmem>>, %arg2: memref<1x8x8xbf16, #tpu.memory_space<vmem>>, %arg3: memref<128x128xbf16, #tpu.memory_space<vmem>>, %arg4: memref<8x1xf32, #tpu.memory_space<vmem>>, %arg5: memref<8x1xf32, #tpu.memory_space<vmem>>, %arg6: memref<1x8x128xf32, #tpu.memory_space<vmem>>, %arg7: memref<1x8x1xf32, #tpu.memory_space<vmem>>, %arg8: memref<1x8x1xf32, #tpu.memory_space<vmem>>) attributes {dimension_semantics = [#tpu.dimension_semantics<parallel>], iteration_bounds = array<i64: 2>, scalar_prefetch = 0 : i64, scratch_operands = 0 : i64, tpu.core_type = #tpu.core_type<tc>, window_params = [{transform_indices = @transform_0, window_bounds = array<i64: 1, 8, 128>}, {transform_indices = @transform_1, window_bounds = array<i64: 1, 8, 8>}, {pipeline_mode = #tpu.pipeline_mode<synchronous>, transform_indices = @transform_2, window_bounds = array<i64: 128, 128>}, {pipeline_mode = #tpu.pipeline_mode<synchronous>, transform_indices = @transform_3, window_bounds = array<i64: 8, 1>}, {pipeline_mode = #tpu.pipeline_mode<synchronous>, transform_indices = @transform_4, window_bounds = array<i64: 8, 1>}, {transform_indices = @transform_5, window_bounds = array<i64: 1, 8, 128>}, {transform_indices = @transform_6, window_bounds = array<i64: 1, 8, 1>}, {transform_indices = @transform_7, window_bounds = array<i64: 1, 8, 1>}]} {
    %c0 = arith.constant 0 : index
    %c0_0 = arith.constant 0 : index
    %c0_1 = arith.constant 0 : index
    %0 = vector.load %arg1[%c0, %c0_0, %c0_1] : memref<1x8x128xf32, #tpu.memory_space<vmem>>, vector<1x8x128xf32>
    %1 = vector.shape_cast %0 : vector<1x8x128xf32> to vector<8x128xf32>
    %c0_2 = arith.constant 0 : index
    %c0_3 = arith.constant 0 : index
    %2 = vector.load %arg4[%c0_2, %c0_3] : memref<8x1xf32, #tpu.memory_space<vmem>>, vector<8x1xf32>
    %3 = vector.broadcast %2 : vector<8x1xf32> to vector<8x128xf32>
    %4 = arith.mulf %1, %3 : vector<8x128xf32>
    %c0_4 = arith.constant 0 : index
    %c0_5 = arith.constant 0 : index
    %5 = vector.load %arg5[%c0_4, %c0_5] : memref<8x1xf32, #tpu.memory_space<vmem>>, vector<8x1xf32>
    %6 = vector.broadcast %5 : vector<8x1xf32> to vector<8x128xf32>
    %7 = arith.addf %4, %6 : vector<8x128xf32>
    %8 = arith.truncf %7 : vector<8x128xf32> to vector<8x128xbf16>
    %c0_6 = arith.constant 0 : index
    %c0_7 = arith.constant 0 : index
    %9 = vector.load %arg3[%c0_6, %c0_7] : memref<128x128xbf16, #tpu.memory_space<vmem>>, vector<128x128xbf16>
    %cst = arith.constant dense<0.000000e+00> : vector<8x128xf32>
    %10 = tpu.matmul %8, %9, %cst {dimension_numbers = #tpu.dot_dimension_numbers<[1], [0], [0], [1], [0, 0, 1, 1], [], []>} : vector<8x128xbf16>, vector<128x128xbf16>, vector<8x128xf32> -> vector<8x128xf32>
    %c0_8 = arith.constant 0 : index
    %c0_9 = arith.constant 0 : index
    %c0_10 = arith.constant 0 : index
    %11 = vector.load %arg2[%c0_8, %c0_9, %c0_10] : memref<1x8x8xbf16, #tpu.memory_space<vmem>>, vector<1x8x8xbf16>
    %12 = vector.shape_cast %11 : vector<1x8x8xbf16> to vector<8x8xbf16>
    %13 = arith.truncf %10 : vector<8x128xf32> to vector<8x128xbf16>
    %cst_11 = arith.constant dense<0.000000e+00> : vector<8x128xf32>
    %14 = tpu.matmul %12, %13, %cst_11 {dimension_numbers = #tpu.dot_dimension_numbers<[1], [0], [0], [1], [0, 0, 1, 1], [], []>} : vector<8x8xbf16>, vector<8x128xbf16>, vector<8x128xf32> -> vector<8x128xf32>
    %c0_12 = arith.constant 0 : index
    %c0_13 = arith.constant 0 : index
    %c0_14 = arith.constant 0 : index
    %15 = vector.load %arg6[%c0_12, %c0_13, %c0_14] : memref<1x8x128xf32, #tpu.memory_space<vmem>>, vector<1x8x128xf32>
    %16 = vector.shape_cast %15 : vector<1x8x128xf32> to vector<8x128xf32>
    %17 = vector.shape_cast %14 : vector<8x128xf32> to vector<1x8x128xf32>
    tpu.vector_store %arg6[%c0_12, %c0_13, %c0_14], %17 {strides = array<i32>} : memref<1x8x128xf32, #tpu.memory_space<vmem>>, vector<1x8x128xf32>,
    %cst_15 = arith.constant dense<0.000000e+00> : vector<8xf32>
    %18 = vector.multi_reduction <add>, %14, %cst_15 [1] : vector<8x128xf32> to vector<8xf32>
    %19 = vector.shape_cast %18 : vector<8xf32> to vector<8x1xf32>
    %c0_16 = arith.constant 0 : index
    %c0_17 = arith.constant 0 : index
    %c0_18 = arith.constant 0 : index
    %20 = vector.load %arg7[%c0_16, %c0_17, %c0_18] : memref<1x8x1xf32, #tpu.memory_space<vmem>>, vector<1x8x1xf32>
    %21 = vector.shape_cast %20 : vector<1x8x1xf32> to vector<8x1xf32>
    %22 = vector.shape_cast %19 : vector<8x1xf32> to vector<1x8x1xf32>
    tpu.vector_store %arg7[%c0_16, %c0_17, %c0_18], %22 {strides = array<i32>} : memref<1x8x1xf32, #tpu.memory_space<vmem>>, vector<1x8x1xf32>,
    %23 = arith.mulf %14, %14 : vector<8x128xf32>
    %cst_19 = arith.constant dense<0.000000e+00> : vector<8xf32>
    %24 = vector.multi_reduction <add>, %23, %cst_19 [1] : vector<8x128xf32> to vector<8xf32>
    %25 = vector.shape_cast %24 : vector<8xf32> to vector<8x1xf32>
    %c0_20 = arith.constant 0 : index
    %c0_21 = arith.constant 0 : index
    %c0_22 = arith.constant 0 : index
    %26 = vector.load %arg8[%c0_20, %c0_21, %c0_22] : memref<1x8x1xf32, #tpu.memory_space<vmem>>, vector<1x8x1xf32>
    %27 = vector.shape_cast %26 : vector<1x8x1xf32> to vector<8x1xf32>
    %28 = vector.shape_cast %25 : vector<8x1xf32> to vector<1x8x1xf32>
    tpu.vector_store %arg8[%c0_20, %c0_21, %c0_22], %28 {strides = array<i32>} : memref<1x8x1xf32, #tpu.memory_space<vmem>>, vector<1x8x1xf32>,
    return
  }
  func.func @transform_0(%arg0: i32) -> (i32, i32, i32) {
    %c0_i32 = arith.constant 0 : i32
    %c0_i32_0 = arith.constant 0 : i32
    %c0_i32_1 = arith.constant 0 : i32
    return %arg0, %c0_i32, %c0_i32_0 : i32, i32, i32
  }
  func.func @transform_1(%arg0: i32) -> (i32, i32, i32) {
    %c0_i32 = arith.constant 0 : i32
    %c0_i32_0 = arith.constant 0 : i32
    %c0_i32_1 = arith.constant 0 : i32
    return %arg0, %c0_i32, %c0_i32_0 : i32, i32, i32
  }
  func.func @transform_2(%arg0: i32) -> (i32, i32) {
    %c0_i32 = arith.constant 0 : i32
    %c0_i32_0 = arith.constant 0 : i32
    %c0_i32_1 = arith.constant 0 : i32
    return %c0_i32, %c0_i32_0 : i32, i32
  }
  func.func @transform_3(%arg0: i32) -> (i32, i32) {
    %c0_i32 = arith.constant 0 : i32
    %c0_i32_0 = arith.constant 0 : i32
    %c0_i32_1 = arith.constant 0 : i32
    return %c0_i32, %c0_i32_0 : i32, i32
  }
  func.func @transform_4(%arg0: i32) -> (i32, i32) {
    %c0_i32 = arith.constant 0 : i32
    %c0_i32_0 = arith.constant 0 : i32
    %c0_i32_1 = arith.constant 0 : i32
    return %c0_i32, %c0_i32_0 : i32, i32
  }
  func.func @transform_5(%arg0: i32) -> (i32, i32, i32) {
    %c0_i32 = arith.constant 0 : i32
    %c0_i32_0 = arith.constant 0 : i32
    %c0_i32_1 = arith.constant 0 : i32
    return %arg0, %c0_i32, %c0_i32_0 : i32, i32, i32
  }
  func.func @transform_6(%arg0: i32) -> (i32, i32, i32) {
    %c0_i32 = arith.constant 0 : i32
    %c0_i32_0 = arith.constant 0 : i32
    %c0_i32_1 = arith.constant 0 : i32
    return %arg0, %c0_i32, %c0_i32_0 : i32, i32, i32
  }
  func.func @transform_7(%arg0: i32) -> (i32, i32, i32) {
    %c0_i32 = arith.constant 0 : i32
    %c0_i32_0 = arith.constant 0 : i32
    %c0_i32_1 = arith.constant 0 : i32
    return %arg0, %c0_i32, %c0_i32_0 : i32, i32, i32
  }
}

module attributes {stable_mosaic.version = 11 : i64} {
  func.func @_stage3_kernel(%arg0: i32, %arg1: memref<1x8x128xf32, #tpu.memory_space<vmem>>, %arg2: memref<8x1xf32, #tpu.memory_space<vmem>>, %arg3: memref<8x1xf32, #tpu.memory_space<vmem>>, %arg4: memref<1x8x128xf32, #tpu.memory_space<vmem>>) attributes {dimension_semantics = [#tpu.dimension_semantics<parallel>], iteration_bounds = array<i64: 2>, scalar_prefetch = 0 : i64, scratch_operands = 0 : i64, tpu.core_type = #tpu.core_type<tc>, window_params = [{transform_indices = @transform_0, window_bounds = array<i64: 1, 8, 128>}, {pipeline_mode = #tpu.pipeline_mode<synchronous>, transform_indices = @transform_1, window_bounds = array<i64: 8, 1>}, {pipeline_mode = #tpu.pipeline_mode<synchronous>, transform_indices = @transform_2, window_bounds = array<i64: 8, 1>}, {transform_indices = @transform_3, window_bounds = array<i64: 1, 8, 128>}]} {
    %c0 = arith.constant 0 : index
    %c0_0 = arith.constant 0 : index
    %c0_1 = arith.constant 0 : index
    %0 = vector.load %arg1[%c0, %c0_0, %c0_1] : memref<1x8x128xf32, #tpu.memory_space<vmem>>, vector<1x8x128xf32>
    %1 = vector.shape_cast %0 : vector<1x8x128xf32> to vector<8x128xf32>
    %c0_2 = arith.constant 0 : index
    %c0_3 = arith.constant 0 : index
    %2 = vector.load %arg2[%c0_2, %c0_3] : memref<8x1xf32, #tpu.memory_space<vmem>>, vector<8x1xf32>
    %3 = vector.broadcast %2 : vector<8x1xf32> to vector<8x128xf32>
    %4 = arith.mulf %1, %3 : vector<8x128xf32>
    %c0_4 = arith.constant 0 : index
    %c0_5 = arith.constant 0 : index
    %5 = vector.load %arg3[%c0_4, %c0_5] : memref<8x1xf32, #tpu.memory_space<vmem>>, vector<8x1xf32>
    %6 = vector.broadcast %5 : vector<8x1xf32> to vector<8x128xf32>
    %7 = arith.addf %4, %6 : vector<8x128xf32>
    %cst = arith.constant 0.000000e+00 : f32
    %8 = vector.broadcast %cst : f32 to vector<8x128xf32>
    %9 = arith.maximumf %7, %8 : vector<8x128xf32>
    %c0_6 = arith.constant 0 : index
    %c0_7 = arith.constant 0 : index
    %c0_8 = arith.constant 0 : index
    %10 = vector.load %arg4[%c0_6, %c0_7, %c0_8] : memref<1x8x128xf32, #tpu.memory_space<vmem>>, vector<1x8x128xf32>
    %11 = vector.shape_cast %10 : vector<1x8x128xf32> to vector<8x128xf32>
    %12 = vector.shape_cast %9 : vector<8x128xf32> to vector<1x8x128xf32>
    tpu.vector_store %arg4[%c0_6, %c0_7, %c0_8], %12 {strides = array<i32>} : memref<1x8x128xf32, #tpu.memory_space<vmem>>, vector<1x8x128xf32>,
    return
  }
  func.func @transform_0(%arg0: i32) -> (i32, i32, i32) {
    %c0_i32 = arith.constant 0 : i32
    %c0_i32_0 = arith.constant 0 : i32
    %c0_i32_1 = arith.constant 0 : i32
    return %arg0, %c0_i32, %c0_i32_0 : i32, i32, i32
  }
  func.func @transform_1(%arg0: i32) -> (i32, i32) {
    %c0_i32 = arith.constant 0 : i32
    %c0_i32_0 = arith.constant 0 : i32
    %c0_i32_1 = arith.constant 0 : i32
    return %c0_i32, %c0_i32_0 : i32, i32
  }
  func.func @transform_2(%arg0: i32) -> (i32, i32) {
    %c0_i32 = arith.constant 0 : i32
    %c0_i32_0 = arith.constant 0 : i32
    %c0_i32_1 = arith.constant 0 : i32
    return %c0_i32, %c0_i32_0 : i32, i32
  }
  func.func @transform_3(%arg0: i32) -> (i32, i32, i32) {
    %c0_i32 = arith.constant 0 : i32
    %c0_i32_0 = arith.constant 0 : i32
    %c0_i32_1 = arith.constant 0 : i32
    return %arg0, %c0_i32, %c0_i32_0 : i32, i32, i32
  }
}

</mosaic_0001>

<bundles_post_ra>
// kernel: gcn_forward.5
= control target key start
LH: loop header
LB: loop body
LE: loop exit
PB: predicated region body
PF: predicated region fallthrough
CT: control target
= control target key end

     0   :  { %8 = vsyncpa [#allocation3], 0  ;;  %s485_s0 = inlined_call_operand.vmem [shape: f32[2,8,128], index: 0, kind: input, shape index: {}]   ;;  %s486_s1 = inlined_call_operand.vmem [shape: f32[8,1], index: 1, kind: input, shape index: {}]   ;;  %s487_s2 = inlined_call_operand.vmem [shape: f32[8,1], index: 2, kind: input, shape index: {}]   ;;  %s488_s3 = inlined_call_operand.hbm [shape: f32[2,8,128], index: 3, kind: output, shape index: {}]  }
   0x1   :  { %10 = vsyncpa [#allocation3 + $0x1], 0  ;;  %s394_s12 = smov 0   ;;  %s396_s13 = smov 0  }
   0x2   :  { %s398_s14 = smov 0   ;;  %s400_s15 = smov 0  }
   0x3 LB: > { %s415_s16 = sadd.s32 4294967295, %s371_s15   ;;  %s258_s17 = sadd.s32 4294967294, %s371_s15   ;;  %s371_s15 = sphi %s400_s15, %s494_s15   ;;  %s367_s14 = sphi %s398_s14, %s493_s14   ;;  %s363_s13 = sphi %s396_s13, %s492_s13   ;;  %s359_s12 = sphi %s394_s12, %s491_s12  }
   0x4   : > { %s419_s18 = sadd.s32 1, %s371_s15   ;;  %s91_s19 = sadd.s32 1, %s367_s14 }
   0x5   : > { %s88_s20 = ssub.s32 %s371_s15, %s419_s18  ;;  %p101_p0 = scmp.ne.s32.totalorder %s367_s14, %s363_s13 }
   0x6   : > { %p89_p1 = scmp.eq.s32.totalorder %s88_s20, 0  ;;  %p102_p2 = scmp.eq.s32.totalorder %s415_s16, 1 }
   0x7   : > { %p107_p3 = scmp.ne.s32.totalorder %s363_s13, %s359_s12  ;;  %p108_p4 = scmp.eq.s32.totalorder %s258_s17, 1 }
   0x8   : > { %s430_s21 = scalar_select %p89_p1, %s367_s14, %s91_s19  }
   0x9   : > { %p432_p5 = por %p102_p2, %p101_p0  ;;  %p436_p6 = por %p108_p4, %p107_p3 }
   0xa   : > { %p261_p7 = scmp.ge.s32.totalorder %s371_s15, 1  ;;  %p139_p8 = scmp.lt.s32.totalorder %s371_s15, 3 }
   0xc   : > { %p140_p9 = pnand %p261_p7, %p139_p8 }
   0xd   : > { %p162_p10 = scmp.lt.s32.totalorder (!%p140_p9), %s415_s16, 1  ;;  %s159_s30 = sand.u32 (!%p140_p9), 1, %s363_s13  }
   0xe   : > { %143 = sbr.rel (%p140_p9) target bundleno = 151 (0x97), region = 32  ;;  %s262_s7 = sshll.u32 (!%p140_p9), %s159_s30, 3 }
   0xf   : > { %s265_s8 = sshll.u32 (!%p140_p9), %s415_s16, 3  ;;  %s161_s17 = scalar_lea.vmem (!%p140_p9), [#allocation2], %s262_s7 }
  0x10   : > { %s194_s11 = scalar_lea.hbm (!%p140_p9), %s488_s3, %s265_s8  ;;  %s196_s19 = sshll.u32 (!%p140_p9), %s161_s17, 4  ;;  %s197_s19 = int_to_ptr.vmem [resolvable:$true] %s196_s19 }
  0x11   : > { %s198_s20 = sshll.u32 (!%p140_p9), %s194_s11, 4  ;;  %s184_s24 = scalar_lea.sflag (!%p140_p9), [#allocation3], %s159_s30  ;;  %s199_s20 = int_to_ptr.hbm [resolvable:$true] %s198_s20 }
  0x12   : > { %s323_s25 = sshra.s32 (!%p140_p9), %s199_s20, 4  ;;  %s324_s25 = int_to_ptr.hbm [resolvable:$true] %s323_s25 }
  0x13   : > { %v167_v0 = vld [vmem:[%s486_s1] sm:$0xff]  ;;  %v373_v1 = vmov 0   ;;  %s163_s28 = scalar_select %p162_p10, %s415_s16, 1 }
  0x14   : > { %308 = vset.pattern.permute.xlu0 %v373_v1  ;;  %v174_v2 = vld [vmem:[%s487_s2] sm:$0xff]  ;;  %s325_s16 = scalar_lea.hbm %s324_s25, 8  ;;  %p330_p0 = scmp.lt.s32.totalorder %s324_s25, %s488_s3 }
  0x15   : > { %170 = vperm.xlu0 %308, %v167_v0   ;;  %s263_s29 = sshll.u32 %s163_s28, 3  ;;  %p326_p11 = scmp.ne.s32.totalorder %s324_s25, %s325_s16 }
  0x16   : > { %s165_s6 = scalar_lea.vmem %s485_s0, %s263_s29  ;;  %s329_s28 = scalar_lea.hbm %s488_s3, 16 }
  0x17   : > { %v166_v4 = vld [vmem:[%s165_s6] sm:$0xff]  ;;  %p327_p12 = pnand %p326_p11, %p432_p5  ;;  %p331_p1 = scmp.lt.s32.totalorder %s329_s28, %s325_s16 }
  0x19   : > { %p328_p13 = pneg %p327_p12  ;;  %p332_p2 = por %p331_p1, %p330_p0 }
  0x1b   : > { %p333_p3 = pnand %p332_p2, %p328_p13 }
  0x1d   : > { %177 = vperm.xlu0 %308, %v174_v2  }
  0x87   : > { %v171_v3 = vpop.permute.xlu0 %170 }
  0x88   : > { %v173_v5 = vmul.f32 %v171_v3, %v166_v4 }
  0x8f   : > { %v178_v6 = vpop.permute.xlu0 %177 }
  0x90   : > { %v180_v7 = vadd.f32 %v178_v6, %v173_v5 }
  0x92   : > { %v181_v8 = vmax.f32 %v180_v7, 0.0 }
  0x94   : > { %182 = vst [vmem:[%s161_s17] sm:$0xff] %v181_v8 }
  0x95   : > { %336 = shalt.err (!%p333_p3)
}
  0x96   : > { %268 = dma.vmem_to_hbm [thread:$0]  (%p432_p5), %s197_s19, 128, %s199_s20, %s184_s24  }
  0x97 PF: > { %p274_p4 = scmp.ge.s32.totalorder %s371_s15, 2  ;;  %s210_s30 = sand.u32 1, %s359_s12  }
  0x98   : > { %s211_s5 = scalar_lea.sflag [#allocation3], %s210_s30 }
  0x99   : > { %p271_p7 = pnand %p274_p4, %p436_p6 }
  0x9b   : > { %p272_p8 = pneg %p271_p7 }
  0x9d   : > { %354 = dma.done.wait (%p272_p8), %s211_s5, 128  }
  0x9e   : > { %356 = vsyncadd (%p272_p8), %s211_s5, 4294967168  ;;  %p13_p9 = scmp.ge.s32.totalorder %s419_s18, 4   ;;  %s491_s12 = smov %s363_s13 }
  0x9f   : > { %s492_s13 = smov %s367_s14  ;;  %s493_s14 = smov %s430_s21 }
  0xa0   : > { %s494_s15 = smov %s419_s18  ;;  %15 = sbr.rel (!%p13_p9) target bundleno = 3 (0x3), region = 67 }
  0xa5   :  { %217 = vsyncpa [#allocation3], 1 }
  0xa6   :  { %219 = vsyncpa [#allocation3 + $0x1], 1 }

// kernel: gcn_forward.4
= control target key start
LH: loop header
LB: loop body
LE: loop exit
PB: predicated region body
PF: predicated region fallthrough
CT: control target
= control target key end

     0   :  { %s677_s24 = smov 0   ;;  %s739_s0 = inlined_call_operand.vmem [shape: f32[2,8,128], index: 0, kind: input, shape index: {}]   ;;  %s740_s1 = inlined_call_operand.vmem [shape: bf16[2,8,8], index: 1, kind: input, shape index: {}]   ;;  %s741_s2 = inlined_call_operand.vmem [shape: bf16[128,128], index: 2, kind: input, shape index: {}]   ;;  %s742_s3 = inlined_call_operand.vmem [shape: f32[8,1], index: 3, kind: input, shape index: {}]   ;;  %s743_s4 = inlined_call_operand.vmem [shape: f32[8,1], index: 4, kind: input, shape index: {}]   ;;  %s744_s5 = inlined_call_operand.vmem [shape: f32[2,8,128], index: 5, kind: output, shape index: {0}]   ;;  %s745_s6 = inlined_call_operand.vmem [shape: f32[2,8,1], index: 6, kind: output, shape index: {1}]   ;;  %s746_s7 = inlined_call_operand.vmem [shape: f32[2,8,1], index: 7, kind: output, shape index: {2}]  }
   0x1 LB: > { %s565_s25 = sadd.s32 4294967295, %s634_s24   ;;  %p569_p0 = scmp.ge.s32.totalorder %s634_s24, 1  ;;  %s634_s24 = sphi %s677_s24, %s18_s24  }
   0x2   : > { %p250_p1 = scmp.lt.s32.totalorder %s634_s24, 3 }
   0x4   : > { %p251_p2 = pnand %p569_p0, %p250_p1 }
   0x5   : > { %p292_p3 = scmp.lt.s32.totalorder (!%p251_p2), %s565_s25, 1 }
   0x6   : > { %254 = sbr.rel (%p251_p2) target bundleno = 523 (0x20b), region = 40 }
   0xb   : > { %v314_v0 = vld [vmem:[%s742_s3] sm:$0xff]  ;;  %v617_v1 = vld [vmem:[%s741_s2 + $0x38] sm:$0xff]  ;;  %v636_v2 = vmov 0   ;;  %v616_v3 = vld [vmem:[%s741_s2 + $0x30] sm:$0xff]  ;;  %s748_s25 = smov (!%p292_p3, %s565_s25), 1  ;;  %vm412_vm0 = vcmask 1043456  }
   0xc   : > { %627 = vset.pattern.permute.xlu0 %v636_v2  ;;  %393 = vmatpush.bf16.msra.mxu0 %v617_v1  ;;  %v615_v4 = vld [vmem:[%s741_s2 + $0x28] sm:$0xff]  ;;  %v321_v5 = vld [vmem:[%s743_s4] sm:$0xff]  ;;  %v613_v7 = vld [vmem:[%s741_s2 + $0x18] sm:$0xff]  ;;  %s715_s23 = sshll.u32 %s748_s25, 3  ;;  %s571_s29 = sshll.u32 %s748_s25, 2  ;;  %vm408_vm1 = vcmask 64512  }
   0xd   : > { %317 = vperm.xlu0 %627, %v314_v0   ;;  %v614_v6 = vld [vmem:[%s741_s2 + $0x20] sm:$0xff]  ;;  %v612_v8 = vld [vmem:[%s741_s2 + $0x10] sm:$0xff]  ;;  %v611_v9 = vld [vmem:[%s741_s2 + $0x8] sm:$0xff]  ;;  %s295_s28 = scalar_lea.vmem %s739_s0, %s715_s23  ;;  %s299_s9 = scalar_lea.vmem %s740_s1, %s571_s29  ;;  %vm432_vm2 = vcmask 7168  }
   0xe   : > { %v610_v10 = vld [vmem:[%s741_s2] sm:$0xff]  ;;  %s303_s12 = scalar_lea.vmem %s744_s5, %s715_s23  ;;  %s307_s14 = scalar_lea.vmem %s745_s6, %s715_s23 }
   0xf   : > { %v313_v12 = vld [vmem:[%s295_s28] sm:$0xff]  ;;  %s311_s17 = scalar_lea.vmem %s746_s7, %s715_s23 }
  0x10   : > { %394 = vmatpush.bf16.msra.mxu0 %v616_v3  ;;  %v406_v20 = vld [vmem:[%s299_s9] sm:$0xf] }
  0x14   : > { %395 = vmatpush.bf16.msra.mxu0 %v615_v4 }
  0x15   : > { %324 = vperm.xlu0 %627, %v321_v5  }
  0x18   : > { %396 = vmatpush.bf16.msra.mxu0 %v614_v6 }
  0x1c   : > { %397 = vmatpush.bf16.msra.mxu0 %v613_v7 }
  0x20   : > { %398 = vmatpush.bf16.msra.mxu0 %v612_v8 }
  0x24   : > { %399 = vmatpush.bf16.msra.mxu0 %v611_v9 }
  0x28   : > { %400 = vmatpush.bf16.msra.mxu0 %v610_v10 }
  0x7f   : > { %v318_v11 = vpop.permute.xlu0 %317 }
  0x80   : > { %v320_v13 = vmul.f32 %v318_v11, %v313_v12 }
  0x87   : > { %v325_v14 = vpop.permute.xlu0 %324 }
  0x88   : > { %v327_v15 = vadd.f32 %v325_v14, %v320_v13 }
  0x8a   : > { %v328_v16 = vpack.c.bf16 %v327_v15, %v327_v15 }
  0x8c   : > { %401 = vmatmul.bf16.vlgmr.msra.gmra.mxu0 %v328_v16 }
 0x109   : > { %v402_v17 = vpop.f32.mrf.mxu0 }
 0x10a   : > { %v407_v18 = vpack.c.bf16 %v402_v17, %v402_v17 }
 0x10c   : > { %v414_v19 = vsel %vm412_vm0, %v407_v18, 0 }
 0x10d   : > { %423 = vmatpush.bf16.msra.mxu1 %v414_v19 }
 0x110   : > { %607 = vmatmul.msk.bf16.vlgmr.msra.gmra.mxu1 %vm408_vm1, %v406_v20 }
 0x111   : > { %v404_v21 = vpop.f32.mrf.mxu0 }
 0x18d   : > { %v425_v22 = vpop.f32.mrf.mxu1 }
 0x18e   : > { %429 = vst [vmem:[%s303_s12] sm:$0xff] %v425_v22  ;;  %430 = vadd.xlane.f32.xlu1 %v425_v22  ;;  %v434_v23 = vmul.f32 %v425_v22, %v425_v22 }
 0x195   : > { %v427_v24 = vpop.f32.mrf.mxu1 }
 0x196   : > { %435 = vadd.xlane.f32.xlu1 %v434_v23 }
 0x201   : > { %v431_v25 = vpop.xlane.xlu1 %430 }
 0x202   : > { %433 = vst.msk [vmem:[%s307_s14] sm:$0xff] %vm432_vm2, %v431_v25 }
 0x209   : > { %v436_v26 = vpop.xlane.xlu1 %435 }
 0x20a   : > { %437 = vst.msk [vmem:[%s311_s17] sm:$0xff] %vm432_vm2, %v436_v26 }
 0x20b PF: > { %s18_s24 = sadd.s32 1, %s634_s24  }
 0x20c   : > { %p15_p4 = scmp.ge.s32.totalorder %s18_s24, 4  }
 0x20e   :  { %17 = sbr.rel (!%p15_p4) target bundleno = 1 (0x1), region = 97 }

// kernel: gcn_forward.3
= control target key start
LH: loop header
LB: loop body
LE: loop exit
PB: predicated region body
PF: predicated region fallthrough
CT: control target
= control target key end

     0   :  { %s642_s21 = smov 0   ;;  %s695_s0 = inlined_call_operand.vmem [shape: bf16[2,8,128], index: 0, kind: input, shape index: {}]   ;;  %s696_s1 = inlined_call_operand.vmem [shape: bf16[2,8,8], index: 1, kind: input, shape index: {}]   ;;  %s697_s2 = inlined_call_operand.vmem [shape: bf16[128,128], index: 2, kind: input, shape index: {}]   ;;  %s698_s3 = inlined_call_operand.vmem [shape: f32[1,128], index: 3, kind: input, shape index: {}]   ;;  %s699_s4 = inlined_call_operand.vmem [shape: f32[2,8,128], index: 4, kind: output, shape index: {0}]   ;;  %s700_s5 = inlined_call_operand.vmem [shape: f32[2,8,1], index: 5, kind: output, shape index: {1}]   ;;  %s701_s6 = inlined_call_operand.vmem [shape: f32[2,8,1], index: 6, kind: output, shape index: {2}]  }
   0x1 LB: > { %s534_s22 = sadd.s32 4294967295, %s605_s21   ;;  %p538_p0 = scmp.ge.s32.totalorder %s605_s21, 1  ;;  %s605_s21 = sphi %s642_s21, %s17_s21  }
   0x2   : > { %p225_p1 = scmp.lt.s32.totalorder %s605_s21, 3 }
   0x4   : > { %p226_p2 = pnand %p538_p0, %p225_p1 }
   0x5   : > { %p265_p3 = scmp.lt.s32.totalorder (!%p226_p2), %s534_s22, 1 }
   0x6   : > { %229 = sbr.rel (%p226_p2) target bundleno = 444 (0x1bc), region = 36 }
   0xb   : > { %v587_v0 = vld [vmem:[%s697_s2 + $0x38] sm:$0xff]  ;;  %v586_v1 = vld [vmem:[%s697_s2 + $0x30] sm:$0xff]  ;;  %v585_v2 = vld [vmem:[%s697_s2 + $0x28] sm:$0xff]  ;;  %s703_s22 = smov (!%p265_p3, %s534_s22), 1  ;;  %vm374_vm0 = vcmask 1043456   ;;  %vm370_vm1 = vcmask 64512  }
   0xc   : > { %355 = vmatpush.bf16.msra.mxu0 %v587_v0  ;;  %v584_v3 = vld [vmem:[%s697_s2 + $0x20] sm:$0xff]  ;;  %v583_v4 = vld [vmem:[%s697_s2 + $0x18] sm:$0xff]  ;;  %v582_v5 = vld [vmem:[%s697_s2 + $0x10] sm:$0xff]  ;;  %s539_s13 = sshll.u32 %s703_s22, 2  ;;  %s541_s26 = sshll.u32 %s703_s22, 3  ;;  %vm401_vm3 = vcmask 7168  }
   0xd   : > { %v581_v6 = vld [vmem:[%s697_s2 + $0x8] sm:$0xff]  ;;  %v580_v7 = vld [vmem:[%s697_s2] sm:$0xff]  ;;  %s268_s18 = scalar_lea.vmem %s695_s0, %s539_s13  ;;  %s272_s25 = scalar_lea.vmem %s696_s1, %s539_s13 }
   0xe   : > { %v286_v8 = vld [vmem:[%s268_s18] sm:$0xf]  ;;  %s276_s29 = scalar_lea.vmem %s699_s4, %s541_s26  ;;  %s280_s8 = scalar_lea.vmem %s700_s5, %s541_s26 }
   0xf   : > { %v596_v9 = vld [vmem:[%s698_s3] ss:$0 sm:$0xff]  ;;  %s284_s10 = scalar_lea.vmem %s701_s6, %s541_s26 }
  0x10   : > { %356 = vmatpush.bf16.msra.mxu0 %v586_v1  ;;  %v368_v14 = vld [vmem:[%s272_s25] sm:$0xf] }
  0x14   : > { %357 = vmatpush.bf16.msra.mxu0 %v585_v2 }
  0x18   : > { %358 = vmatpush.bf16.msra.mxu0 %v584_v3 }
  0x1c   : > { %359 = vmatpush.bf16.msra.mxu0 %v583_v4 }
  0x20   : > { %360 = vmatpush.bf16.msra.mxu0 %v582_v5 }
  0x24   : > { %361 = vmatpush.bf16.msra.mxu0 %v581_v6 }
  0x28   : > { %362 = vmatpush.bf16.msra.mxu0 %v580_v7 }
  0x2b   : > { %363 = vmatmul.bf16.vlgmr.msra.gmra.mxu0 %v286_v8 }
  0xa8   : > { %v364_v10 = vpop.f32.mrf.mxu0 }
  0xa9   : > { %v365_v11 = vadd.f32 %v596_v9, %v364_v10 }
  0xab   : > { %v369_v12 = vpack.c.bf16 %v365_v11, %v365_v11 }
  0xad   : > { %v376_v13 = vsel %vm374_vm0, %v369_v12, 0 }
  0xae   : > { %385 = vmatpush.bf16.msra.mxu1 %v376_v13 }
  0xb0   : > { %v366_v15 = vpop.f32.mrf.mxu0 }
  0xb1   : > { %576 = vmatmul.msk.bf16.vlgmr.msra.gmra.mxu1 %vm370_vm1, %v368_v14 }
 0x12e   : > { %v387_v16 = vpop.f32.mrf.mxu1 }
 0x12f   : > { %v392_v17 = vmul.f32 1.442695, %v387_v16  ;;  %vm391_vm2 = vcmp.gt.f32.partialorder %v387_v16, 0.0 }
 0x131   : > { %597 = vpow2.f32 %v392_v17 }
 0x136   : > { %v389_v18 = vpop.f32.mrf.mxu1 }
 0x137   : > { %v598_v19 = vpop.eup %597 }
 0x138   : > { %v577_v20 = vadd.f32 -1.0, %v598_v19 }
 0x13a   : > { %v395_v21 = vmul.f32 1.6732632, %v577_v20 }
 0x13c   : > { %v396_v22 = vsel %vm391_vm2, %v387_v16, %v395_v21 }
 0x13d   : > { %v397_v23 = vmul.f32 1.050701, %v396_v22 }
 0x13f   : > { %398 = vst [vmem:[%s276_s29] sm:$0xff] %v397_v23  ;;  %399 = vadd.xlane.f32.xlu0 %v397_v23  ;;  %v403_v24 = vmul.f32 %v397_v23, %v397_v23 }
 0x147   : > { %404 = vadd.xlane.f32.xlu0 %v403_v24 }
 0x1b2   : > { %v400_v25 = vpop.xlane.xlu0 %399 }
 0x1b3   : > { %402 = vst.msk [vmem:[%s280_s8] sm:$0xff] %vm401_vm3, %v400_v25 }
 0x1ba   : > { %v405_v26 = vpop.xlane.xlu0 %404 }
 0x1bb   : > { %406 = vst.msk [vmem:[%s284_s10] sm:$0xff] %vm401_vm3, %v405_v26 }
 0x1bc PF: > { %s17_s21 = sadd.s32 1, %s605_s21  }
 0x1bd   : > { %p14_p4 = scmp.ge.s32.totalorder %s17_s21, 4  }
 0x1bf   :  { %16 = sbr.rel (!%p14_p4) target bundleno = 1 (0x1), region = 93 }

</bundles_post_ra>
